<compile_context>
chip_gen: v5e
topology: v5e:2x2
jax: 0.10.0
libtpu: 0.0.40
codegen_flags: <defaults>
</compile_context>

<pallas_src>
import math
from functools import partial

import jax
import jax.numpy as jnp
from jax.experimental import pallas as pl
from jax.experimental.pallas import tpu as pltpu


# --------------------------------------------------------------------------
# Pallas kernel: one grid step handles `Bb` batch elements end-to-end.
# --------------------------------------------------------------------------
def _adapter_kernel(x_ref, ctx_ref, mask_ref,
                    wd_ref, bd_ref,            # down_proj (transposed) + bias
                    wq_ref, bq_ref,            # q proj (scale pre-folded)
                    wkv_ref, bkv_ref,          # fused k|v proj
                    wo_ref, bo_ref,            # attention out proj
                    g2_ref, be2_ref,           # LayerNorm2
                    w1_ref, b1_ref,            # FFN linear1
                    w2_ref, b2_ref,            # FFN linear2
                    g3_ref, be3_ref,           # LayerNorm3
                    wu_ref, bu_ref,            # up_proj (adapter scale folded)
                    out_ref, *, num_heads, eps=1e-5):
    f32 = jnp.float32
    Bb, L, d_model = x_ref.shape
    _, S, d_down = ctx_ref.shape
    hd = d_down // num_heads

    # ---- down_proj + ReLU over the whole (Bb*L, d_model) slab -------------
    x = x_ref[...].reshape(Bb * L, d_model)
    t = jnp.maximum(
        jnp.dot(x, wd_ref[...], preferred_element_type=f32) + bd_ref[...], 0.0)

    # ---- projections: q on queries, fused k|v on the memory context -------
    q = jnp.dot(t, wq_ref[...], preferred_element_type=f32) + bq_ref[...]
    ctx = ctx_ref[...].reshape(Bb * S, d_down)
    kv = jnp.dot(ctx, wkv_ref[...], preferred_element_type=f32) + bkv_ref[...]

    mask_all = mask_ref[...]                                   # (Bb, 1, S)

    # ---- per-batch, per-head scaled-dot-product attention -----------------
    attn_rows = []
    for b in range(Bb):                      # static loops, traced once
        qb = q[b * L:(b + 1) * L]                              # (L, d_down)
        kvb = kv[b * S:(b + 1) * S]                            # (S, 2*d_down)
        kb = kvb[:, :d_down]
        vb = kvb[:, d_down:]
        bias = mask_all[b]                                     # (1, S)
        head_outs = []
        for h in range(num_heads):
            qh = qb[:, h * hd:(h + 1) * hd]
            kh = kb[:, h * hd:(h + 1) * hd]
            vh = vb[:, h * hd:(h + 1) * hd]
            s = jax.lax.dot_general(qh, kh, (((1,), (1,)), ((), ())),
                                    preferred_element_type=f32)  # (L, S)
            s = s + bias
            s = s - jnp.max(s, axis=-1, keepdims=True)
            p = jnp.exp(s)
            p = p * pl.reciprocal(jnp.sum(p, axis=-1, keepdims=True),
                                  approx=True)
            head_outs.append(jnp.dot(p, vh, preferred_element_type=f32))
        attn_rows.append(jnp.concatenate(head_outs, axis=-1))  # (L, d_down)
    attn = jnp.concatenate(attn_rows, axis=0)                  # (Bb*L, d_down)

    # ---- out proj + residual + LayerNorm2 ----------------------------------
    a = jnp.dot(attn, wo_ref[...], preferred_element_type=f32) + bo_ref[...]
    h1 = t + a
    mu = jnp.mean(h1, axis=-1, keepdims=True)
    var = jnp.mean(jnp.square(h1 - mu), axis=-1, keepdims=True)
    h1 = (h1 - mu) * jax.lax.rsqrt(var + eps) * g2_ref[...] + be2_ref[...]

    # ---- FFN (relu) + residual + LayerNorm3 --------------------------------
    f = jnp.maximum(
        jnp.dot(h1, w1_ref[...], preferred_element_type=f32) + b1_ref[...], 0.0)
    f = jnp.dot(f, w2_ref[...], preferred_element_type=f32) + b2_ref[...]
    h2 = h1 + f
    mu = jnp.mean(h2, axis=-1, keepdims=True)
    var = jnp.mean(jnp.square(h2 - mu), axis=-1, keepdims=True)
    h2 = (h2 - mu) * jax.lax.rsqrt(var + eps) * g3_ref[...] + be3_ref[...]

    # ---- up_proj (adapter scale already folded into wu/bu) -----------------
    up = jnp.dot(h2, wu_ref[...], preferred_element_type=f32) + bu_ref[...]
    out_ref[...] = up.reshape(Bb, L, d_model).astype(out_ref.dtype)


# --------------------------------------------------------------------------
# One-time parameter preparation (pre-transpose, fuse K|V, fold scales).
# --------------------------------------------------------------------------
def prepare_adapter_params(p, *, num_heads, adapter_scale=1.0,
                           compute_dtype=jnp.float32):
    d_down = p["down_w"].shape[0]
    hd = d_down // num_heads
    qscale = 1.0 / math.sqrt(hd)
    scale = jnp.asarray(adapter_scale, jnp.float32)

    def cvt(a):
        return a.astype(compute_dtype)

    prep = {
        "wd_t": cvt(p["down_w"].T), "bd": cvt(p["down_b"][None, :]),
        "wq_t": cvt(p["q_w"].T * qscale), "bq": cvt((p["q_b"] * qscale)[None, :]),
        "wkv_t": cvt(jnp.concatenate([p["k_w"].T, p["v_w"].T], axis=1)),
        "bkv": cvt(jnp.concatenate([p["k_b"], p["v_b"]])[None, :]),
        "wo_t": cvt(p["out_w"].T), "bo": cvt(p["out_b"][None, :]),
        "g2": cvt(p["ln2_g"][None, :]), "be2": cvt(p["ln2_b"][None, :]),
        "w1_t": cvt(p["lin1_w"].T), "b1": cvt(p["lin1_b"][None, :]),
        "w2_t": cvt(p["lin2_w"].T), "b2": cvt(p["lin2_b"][None, :]),
        "g3": cvt(p["ln3_g"][None, :]), "be3": cvt(p["ln3_b"][None, :]),
        "wu_t": cvt(p["up_w"].T * scale), "bu": cvt((p["up_b"] * scale)[None, :]),
    }
    return prep


def _pick_batch_block(n, l):
    """Fold batch elements so the matmul M-dim is ~128 while keeping >=2
    grid steps (both v7x TensorCores get work)."""
    if n <= 1:
        return max(n, 1)
    target = max(1, (128 + l - 1) // l)
    bb = max(1, min(target, n // 2))
    while n % bb:
        bb -= 1
    return bb


# --------------------------------------------------------------------------
# Wrapper: mirrors Adapter.forward with prior given.
# --------------------------------------------------------------------------
def adapter_forward_pallas(x, prior, prep, *, num_heads=2, text_context=None,
                           batch_block=None, compute_dtype=jnp.float32):
    context, key_padding_mask = prior
    if text_context is not None:                      # multi_cross path
        txt_prior, txt_mask = text_context
        context = jnp.concatenate([context, txt_prior], axis=1)
        key_padding_mask = jnp.concatenate([key_padding_mask, txt_mask], axis=1)

    L, N, d_model = x.shape
    _, S, d_down = context.shape
    out_dtype = x.dtype

    xb = jnp.transpose(x, (1, 0, 2)).astype(compute_dtype)        # (N, L, E)
    ctx = context.astype(compute_dtype)                           # (N, S, d_down)
    mask_bias = jnp.where(key_padding_mask, -1e9, 0.0).astype(
        jnp.float32)[:, None, :]                                  # (N, 1, S)

    bb = batch_block or _pick_batch_block(N, L)
    grid = (N // bb,)

    weight_names = ["wd_t", "bd", "wq_t", "bq", "wkv_t", "bkv", "wo_t", "bo",
                    "g2", "be2", "w1_t", "b1", "w2_t", "b2", "g3", "be3",
                    "wu_t", "bu"]
    weights = [prep[n] for n in weight_names]
    weight_specs = [pl.BlockSpec(w.shape, lambda i: (0, 0)) for w in weights]

    kernel = partial(_adapter_kernel, num_heads=num_heads)
    out = pl.pallas_call(
        kernel,
        out_shape=jax.ShapeDtypeStruct((N, L, d_model), out_dtype),
        grid=grid,
        in_specs=[
            pl.BlockSpec((bb, L, d_model), lambda i: (i, 0, 0)),  # x
            pl.BlockSpec((bb, S, d_down), lambda i: (i, 0, 0)),   # context
            pl.BlockSpec((bb, 1, S), lambda i: (i, 0, 0)),        # mask bias
        ] + weight_specs,
        out_specs=pl.BlockSpec((bb, L, d_model), lambda i: (i, 0, 0)),
        compiler_params=pltpu.CompilerParams(
            dimension_semantics=("parallel",),
            vmem_limit_bytes=64 * 1024 * 1024),
    )(xb, ctx, mask_bias, *weights)

    return jnp.transpose(out, (1, 0, 2))                          # (L, N, E)


# --------------------------------------------------------------------------
# Pure-jnp reference reproducing the PyTorch math (eval mode).
# --------------------------------------------------------------------------
def _layernorm_ref(x, g, b, eps=1e-5):
    mu = jnp.mean(x, axis=-1, keepdims=True)
    var = jnp.mean(jnp.square(x - mu), axis=-1, keepdims=True)
    return (x - mu) * jax.lax.rsqrt(var + eps) * g + b


def _reference_jax(x, context, mask, p, *, num_heads, adapter_scale=1.0,
                   eps=1e-5):
    L, N, dm = x.shape
    S = context.shape[1]
    dd = p["down_w"].shape[0]
    hd = dd // num_heads

    t = jnp.maximum(jnp.einsum("lnd,ed->lne", x, p["down_w"]) + p["down_b"], 0.0)
    mem = jnp.transpose(context, (1, 0, 2))                       # (S, N, dd)

    q = jnp.einsum("lne,fe->lnf", t, p["q_w"]) + p["q_b"]
    k = jnp.einsum("sne,fe->snf", mem, p["k_w"]) + p["k_b"]
    v = jnp.einsum("sne,fe->snf", mem, p["v_w"]) + p["v_b"]
    q = q.reshape(L, N, num_heads, hd).transpose(1, 2, 0, 3) * (hd ** -0.5)
    k = k.reshape(S, N, num_heads, hd).transpose(1, 2, 0, 3)
    v = v.reshape(S, N, num_heads, hd).transpose(1, 2, 0, 3)
    s = jnp.einsum("nhld,nhsd->nhls", q, k)
    s = s + jnp.where(mask, -1e9, 0.0)[:, None, None, :]
    pr = jax.nn.softmax(s, axis=-1)
    o = jnp.einsum("nhls,nhsd->nhld", pr, v).transpose(2, 0, 1, 3).reshape(L, N, dd)
    a = jnp.einsum("lne,fe->lnf", o, p["out_w"]) + p["out_b"]

    h1 = _layernorm_ref(t + a, p["ln2_g"], p["ln2_b"], eps)
    f = jnp.maximum(jnp.einsum("lne,fe->lnf", h1, p["lin1_w"]) + p["lin1_b"], 0.0)
    f = jnp.einsum("lnf,ef->lne", f, p["lin2_w"]) + p["lin2_b"]
    h2 = _layernorm_ref(h1 + f, p["ln3_g"], p["ln3_b"], eps)

    up = jnp.einsum("lne,de->lnd", h2, p["up_w"]) + p["up_b"]
    return up * adapter_scale


# --------------------------------------------------------------------------
if __name__ == "__main__":
    # Small shapes consistent with Adapter: seq L=8, batch N=2, d_model=32,
    # bottleneck (down_size)=16, nhead=2, dim_feedforward=2*down_size=32,
    # prior context length S=8.
    L, N, S = 8, 2, 8
    d_model, d_down, num_heads = 32, 16, 2
    d_ff = 2 * d_down
    adapter_scale = 1.0

    key = jax.random.PRNGKey(0)
    ks = jax.random.split(key, 24)
    f32 = jnp.float32

    def rnd(k, shape, s=0.1):
        return jax.random.normal(k, shape, f32) * s

    params = {
        "down_w": rnd(ks[0], (d_down, d_model)), "down_b": rnd(ks[1], (d_down,)),
        "q_w": rnd(ks[2], (d_down, d_down)),     "q_b": rnd(ks[3], (d_down,)),
        "k_w": rnd(ks[4], (d_down, d_down)),     "k_b": rnd(ks[5], (d_down,)),
        "v_w": rnd(ks[6], (d_down, d_down)),     "v_b": rnd(ks[7], (d_down,)),
        "out_w": rnd(ks[8], (d_down, d_down)),   "out_b": rnd(ks[9], (d_down,)),
        "ln2_g": 1.0 + rnd(ks[10], (d_down,)),   "ln2_b": rnd(ks[11], (d_down,)),
        "lin1_w": rnd(ks[12], (d_ff, d_down)),   "lin1_b": rnd(ks[13], (d_ff,)),
        "lin2_w": rnd(ks[14], (d_down, d_ff)),   "lin2_b": rnd(ks[15], (d_down,)),
        "ln3_g": 1.0 + rnd(ks[16], (d_down,)),   "ln3_b": rnd(ks[17], (d_down,)),
        "up_w": rnd(ks[18], (d_model, d_down)),  "up_b": rnd(ks[19], (d_model,)),
    }

    x = jax.random.normal(ks[20], (L, N, d_model), f32)          # (L, N, E)
    context = jax.random.normal(ks[21], (N, S, d_down), f32)     # prior[0]
    # bool key-padding mask: pad the last 3 context tokens of batch 1
    key_padding_mask = jnp.zeros((N, S), jnp.bool_).at[1, S - 3:].set(True)

    prep = prepare_adapter_params(params, num_heads=num_heads,
                                  adapter_scale=adapter_scale)
    out = adapter_forward_pallas(x, (context, key_padding_mask), prep,
                                 num_heads=num_heads)
    jax.block_until_ready(out)

    ref = _reference_jax(x, context, key_padding_mask, params,
                         num_heads=num_heads, adapter_scale=adapter_scale)
    assert out.shape == (L, N, d_model)
    assert jnp.allclose(out, ref, atol=2e-3, rtol=2e-3), \
        float(jnp.max(jnp.abs(out - ref)))

    print("KERNEL_OK")
</pallas_src>

<mosaic_0001>
module attributes {stable_mosaic.version = 11 : i64} {
  func.func @_adapter_kernel(%arg0: i32, %arg1: memref<1x8x32xf32, #tpu.memory_space<vmem>>, %arg2: memref<1x8x16xf32, #tpu.memory_space<vmem>>, %arg3: memref<1x1x8xf32, #tpu.memory_space<vmem>>, %arg4: memref<32x16xf32, #tpu.memory_space<vmem>>, %arg5: memref<1x16xf32, #tpu.memory_space<vmem>>, %arg6: memref<16x16xf32, #tpu.memory_space<vmem>>, %arg7: memref<1x16xf32, #tpu.memory_space<vmem>>, %arg8: memref<16x32xf32, #tpu.memory_space<vmem>>, %arg9: memref<1x32xf32, #tpu.memory_space<vmem>>, %arg10: memref<16x16xf32, #tpu.memory_space<vmem>>, %arg11: memref<1x16xf32, #tpu.memory_space<vmem>>, %arg12: memref<1x16xf32, #tpu.memory_space<vmem>>, %arg13: memref<1x16xf32, #tpu.memory_space<vmem>>, %arg14: memref<16x32xf32, #tpu.memory_space<vmem>>, %arg15: memref<1x32xf32, #tpu.memory_space<vmem>>, %arg16: memref<32x16xf32, #tpu.memory_space<vmem>>, %arg17: memref<1x16xf32, #tpu.memory_space<vmem>>, %arg18: memref<1x16xf32, #tpu.memory_space<vmem>>, %arg19: memref<1x16xf32, #tpu.memory_space<vmem>>, %arg20: memref<16x32xf32, #tpu.memory_space<vmem>>, %arg21: memref<1x32xf32, #tpu.memory_space<vmem>>, %arg22: memref<1x8x32xf32, #tpu.memory_space<vmem>>) attributes {dimension_semantics = [#tpu.dimension_semantics<parallel>], iteration_bounds = array<i64: 2>, scalar_prefetch = 0 : i64, scratch_operands = 0 : i64, tpu.core_type = #tpu.core_type<tc>, window_params = [{transform_indices = @transform_0, window_bounds = array<i64: 1, 8, 32>}, {transform_indices = @transform_1, window_bounds = array<i64: 1, 8, 16>}, {transform_indices = @transform_2, window_bounds = array<i64: 1, 1, 8>}, {pipeline_mode = #tpu.pipeline_mode<synchronous>, transform_indices = @transform_3, window_bounds = array<i64: 32, 16>}, {pipeline_mode = #tpu.pipeline_mode<synchronous>, transform_indices = @transform_4, window_bounds = array<i64: 1, 16>}, {pipeline_mode = #tpu.pipeline_mode<synchronous>, transform_indices = @transform_5, window_bounds = array<i64: 16, 16>}, {pipeline_mode = #tpu.pipeline_mode<synchronous>, transform_indices = @transform_6, window_bounds = array<i64: 1, 16>}, {pipeline_mode = #tpu.pipeline_mode<synchronous>, transform_indices = @transform_7, window_bounds = array<i64: 16, 32>}, {pipeline_mode = #tpu.pipeline_mode<synchronous>, transform_indices = @transform_8, window_bounds = array<i64: 1, 32>}, {pipeline_mode = #tpu.pipeline_mode<synchronous>, transform_indices = @transform_9, window_bounds = array<i64: 16, 16>}, {pipeline_mode = #tpu.pipeline_mode<synchronous>, transform_indices = @transform_10, window_bounds = array<i64: 1, 16>}, {pipeline_mode = #tpu.pipeline_mode<synchronous>, transform_indices = @transform_11, window_bounds = array<i64: 1, 16>}, {pipeline_mode = #tpu.pipeline_mode<synchronous>, transform_indices = @transform_12, window_bounds = array<i64: 1, 16>}, {pipeline_mode = #tpu.pipeline_mode<synchronous>, transform_indices = @transform_13, window_bounds = array<i64: 16, 32>}, {pipeline_mode = #tpu.pipeline_mode<synchronous>, transform_indices = @transform_14, window_bounds = array<i64: 1, 32>}, {pipeline_mode = #tpu.pipeline_mode<synchronous>, transform_indices = @transform_15, window_bounds = array<i64: 32, 16>}, {pipeline_mode = #tpu.pipeline_mode<synchronous>, transform_indices = @transform_16, window_bounds = array<i64: 1, 16>}, {pipeline_mode = #tpu.pipeline_mode<synchronous>, transform_indices = @transform_17, window_bounds = array<i64: 1, 16>}, {pipeline_mode = #tpu.pipeline_mode<synchronous>, transform_indices = @transform_18, window_bounds = array<i64: 1, 16>}, {pipeline_mode = #tpu.pipeline_mode<synchronous>, transform_indices = @transform_19, window_bounds = array<i64: 16, 32>}, {pipeline_mode = #tpu.pipeline_mode<synchronous>, transform_indices = @transform_20, window_bounds = array<i64: 1, 32>}, {transform_indices = @transform_21, window_bounds = array<i64: 1, 8, 32>}]} {
    %c0 = arith.constant 0 : index
    %c0_0 = arith.constant 0 : index
    %c0_1 = arith.constant 0 : index
    %0 = vector.load %arg1[%c0, %c0_0, %c0_1] : memref<1x8x32xf32, #tpu.memory_space<vmem>>, vector<1x8x32xf32>
    %1 = vector.shape_cast %0 : vector<1x8x32xf32> to vector<8x32xf32>
    %c0_2 = arith.constant 0 : index
    %c0_3 = arith.constant 0 : index
    %2 = vector.load %arg4[%c0_2, %c0_3] : memref<32x16xf32, #tpu.memory_space<vmem>>, vector<32x16xf32>
    %cst = arith.constant dense<0.000000e+00> : vector<8x16xf32>
    %3 = tpu.matmul %1, %2, %cst {dimension_numbers = #tpu.dot_dimension_numbers<[1], [0], [0], [1], [0, 0, 1, 1], [], []>} : vector<8x32xf32>, vector<32x16xf32>, vector<8x16xf32> -> vector<8x16xf32>
    %c0_4 = arith.constant 0 : index
    %c0_5 = arith.constant 0 : index
    %4 = vector.load %arg5[%c0_4, %c0_5] : memref<1x16xf32, #tpu.memory_space<vmem>>, vector<1x16xf32>
    %5 = vector.broadcast %4 : vector<1x16xf32> to vector<8x16xf32>
    %6 = arith.addf %3, %5 : vector<8x16xf32>
    %cst_6 = arith.constant 0.000000e+00 : f32
    %7 = vector.broadcast %cst_6 : f32 to vector<8x16xf32>
    %8 = arith.maximumf %6, %7 : vector<8x16xf32>
    %c0_7 = arith.constant 0 : index
    %c0_8 = arith.constant 0 : index
    %9 = vector.load %arg6[%c0_7, %c0_8] : memref<16x16xf32, #tpu.memory_space<vmem>>, vector<16x16xf32>
    %cst_9 = arith.constant dense<0.000000e+00> : vector<8x16xf32>
    %10 = tpu.matmul %8, %9, %cst_9 {dimension_numbers = #tpu.dot_dimension_numbers<[1], [0], [0], [1], [0, 0, 1, 1], [], []>} : vector<8x16xf32>, vector<16x16xf32>, vector<8x16xf32> -> vector<8x16xf32>
    %c0_10 = arith.constant 0 : index
    %c0_11 = arith.constant 0 : index
    %11 = vector.load %arg7[%c0_10, %c0_11] : memref<1x16xf32, #tpu.memory_space<vmem>>, vector<1x16xf32>
    %12 = vector.broadcast %11 : vector<1x16xf32> to vector<8x16xf32>
    %13 = arith.addf %10, %12 : vector<8x16xf32>
    %c0_12 = arith.constant 0 : index
    %c0_13 = arith.constant 0 : index
    %c0_14 = arith.constant 0 : index
    %14 = vector.load %arg2[%c0_12, %c0_13, %c0_14] : memref<1x8x16xf32, #tpu.memory_space<vmem>>, vector<1x8x16xf32>
    %15 = vector.shape_cast %14 : vector<1x8x16xf32> to vector<8x16xf32>
    %c0_15 = arith.constant 0 : index
    %c0_16 = arith.constant 0 : index
    %16 = vector.load %arg8[%c0_15, %c0_16] : memref<16x32xf32, #tpu.memory_space<vmem>>, vector<16x32xf32>
    %cst_17 = arith.constant dense<0.000000e+00> : vector<8x32xf32>
    %17 = tpu.matmul %15, %16, %cst_17 {dimension_numbers = #tpu.dot_dimension_numbers<[1], [0], [0], [1], [0, 0, 1, 1], [], []>} : vector<8x16xf32>, vector<16x32xf32>, vector<8x32xf32> -> vector<8x32xf32>
    %c0_18 = arith.constant 0 : index
    %c0_19 = arith.constant 0 : index
    %18 = vector.load %arg9[%c0_18, %c0_19] : memref<1x32xf32, #tpu.memory_space<vmem>>, vector<1x32xf32>
    %19 = vector.broadcast %18 : vector<1x32xf32> to vector<8x32xf32>
    %20 = arith.addf %17, %19 : vector<8x32xf32>
    %c0_20 = arith.constant 0 : index
    %c0_21 = arith.constant 0 : index
    %c0_22 = arith.constant 0 : index
    %21 = vector.load %arg3[%c0_20, %c0_21, %c0_22] : memref<1x1x8xf32, #tpu.memory_space<vmem>>, vector<1x1x8xf32>
    %22 = vector.extract_strided_slice %20 {offsets = [0, 0], sizes = [8, 16], strides = [1, 1]} : vector<8x32xf32> to vector<8x16xf32>
    %23 = vector.extract_strided_slice %20 {offsets = [0, 16], sizes = [8, 16], strides = [1, 1]} : vector<8x32xf32> to vector<8x16xf32>
    %24 = vector.shape_cast %21 : vector<1x1x8xf32> to vector<1x8xf32>
    %25 = vector.extract_strided_slice %13 {offsets = [0, 0], sizes = [8, 8], strides = [1, 1]} : vector<8x16xf32> to vector<8x8xf32>
    %26 = vector.extract_strided_slice %22 {offsets = [0, 0], sizes = [8, 8], strides = [1, 1]} : vector<8x16xf32> to vector<8x8xf32>
    %27 = vector.extract_strided_slice %23 {offsets = [0, 0], sizes = [8, 8], strides = [1, 1]} : vector<8x16xf32> to vector<8x8xf32>
    %cst_23 = arith.constant dense<0.000000e+00> : vector<8x8xf32>
    %28 = tpu.matmul %25, %26, %cst_23 {dimension_numbers = #tpu.dot_dimension_numbers<[1], [1], [0], [0], [0, 0, 1, 0], [], []>} : vector<8x8xf32>, vector<8x8xf32>, vector<8x8xf32> -> vector<8x8xf32>
    %29 = vector.broadcast %24 : vector<1x8xf32> to vector<8x8xf32>
    %30 = arith.addf %28, %29 : vector<8x8xf32>
    %cst_24 = arith.constant dense<0xFF800000> : vector<8xf32>
    %31 = vector.multi_reduction <maximumf>, %30, %cst_24 [1] : vector<8x8xf32> to vector<8xf32>
    %32 = vector.shape_cast %31 : vector<8xf32> to vector<8x1xf32>
    %33 = vector.broadcast %32 : vector<8x1xf32> to vector<8x8xf32>
    %34 = arith.subf %30, %33 : vector<8x8xf32>
    %35 = math.exp %34 : vector<8x8xf32>
    %cst_25 = arith.constant dense<0.000000e+00> : vector<8xf32>
    %36 = vector.multi_reduction <add>, %35, %cst_25 [1] : vector<8x8xf32> to vector<8xf32>
    %37 = vector.shape_cast %36 : vector<8xf32> to vector<8x1xf32>
    %38 = tpu.reciprocal %37 {approx = true} : vector<8x1xf32> -> vector<8x1xf32>
    %39 = vector.broadcast %38 : vector<8x1xf32> to vector<8x8xf32>
    %40 = arith.mulf %35, %39 : vector<8x8xf32>
    %cst_26 = arith.constant dense<0.000000e+00> : vector<8x8xf32>
    %41 = tpu.matmul %40, %27, %cst_26 {dimension_numbers = #tpu.dot_dimension_numbers<[1], [0], [0], [1], [0, 0, 1, 1], [], []>} : vector<8x8xf32>, vector<8x8xf32>, vector<8x8xf32> -> vector<8x8xf32>
    %42 = vector.extract_strided_slice %13 {offsets = [0, 8], sizes = [8, 8], strides = [1, 1]} : vector<8x16xf32> to vector<8x8xf32>
    %43 = vector.extract_strided_slice %22 {offsets = [0, 8], sizes = [8, 8], strides = [1, 1]} : vector<8x16xf32> to vector<8x8xf32>
    %44 = vector.extract_strided_slice %23 {offsets = [0, 8], sizes = [8, 8], strides = [1, 1]} : vector<8x16xf32> to vector<8x8xf32>
    %cst_27 = arith.constant dense<0.000000e+00> : vector<8x8xf32>
    %45 = tpu.matmul %42, %43, %cst_27 {dimension_numbers = #tpu.dot_dimension_numbers<[1], [1], [0], [0], [0, 0, 1, 0], [], []>} : vector<8x8xf32>, vector<8x8xf32>, vector<8x8xf32> -> vector<8x8xf32>
    %46 = vector.broadcast %24 : vector<1x8xf32> to vector<8x8xf32>
    %47 = arith.addf %45, %46 : vector<8x8xf32>
    %cst_28 = arith.constant dense<0xFF800000> : vector<8xf32>
    %48 = vector.multi_reduction <maximumf>, %47, %cst_28 [1] : vector<8x8xf32> to vector<8xf32>
    %49 = vector.shape_cast %48 : vector<8xf32> to vector<8x1xf32>
    %50 = vector.broadcast %49 : vector<8x1xf32> to vector<8x8xf32>
    %51 = arith.subf %47, %50 : vector<8x8xf32>
    %52 = math.exp %51 : vector<8x8xf32>
    %cst_29 = arith.constant dense<0.000000e+00> : vector<8xf32>
    %53 = vector.multi_reduction <add>, %52, %cst_29 [1] : vector<8x8xf32> to vector<8xf32>
    %54 = vector.shape_cast %53 : vector<8xf32> to vector<8x1xf32>
    %55 = tpu.reciprocal %54 {approx = true} : vector<8x1xf32> -> vector<8x1xf32>
    %56 = vector.broadcast %55 : vector<8x1xf32> to vector<8x8xf32>
    %57 = arith.mulf %52, %56 : vector<8x8xf32>
    %cst_30 = arith.constant dense<0.000000e+00> : vector<8x8xf32>
    %58 = tpu.matmul %57, %44, %cst_30 {dimension_numbers = #tpu.dot_dimension_numbers<[1], [0], [0], [1], [0, 0, 1, 1], [], []>} : vector<8x8xf32>, vector<8x8xf32>, vector<8x8xf32> -> vector<8x8xf32>
    %59 = tpu.concatenate %41, %58 in 1 : vector<8x8xf32>, vector<8x8xf32> -> vector<8x16xf32>
    %c0_31 = arith.constant 0 : index
    %c0_32 = arith.constant 0 : index
    %60 = vector.load %arg10[%c0_31, %c0_32] : memref<16x16xf32, #tpu.memory_space<vmem>>, vector<16x16xf32>
    %cst_33 = arith.constant dense<0.000000e+00> : vector<8x16xf32>
    %61 = tpu.matmul %59, %60, %cst_33 {dimension_numbers = #tpu.dot_dimension_numbers<[1], [0], [0], [1], [0, 0, 1, 1], [], []>} : vector<8x16xf32>, vector<16x16xf32>, vector<8x16xf32> -> vector<8x16xf32>
    %c0_34 = arith.constant 0 : index
    %c0_35 = arith.constant 0 : index
    %62 = vector.load %arg11[%c0_34, %c0_35] : memref<1x16xf32, #tpu.memory_space<vmem>>, vector<1x16xf32>
    %63 = vector.broadcast %62 : vector<1x16xf32> to vector<8x16xf32>
    %64 = arith.addf %61, %63 : vector<8x16xf32>
    %65 = arith.addf %8, %64 : vector<8x16xf32>
    %cst_36 = arith.constant dense<0.000000e+00> : vector<8xf32>
    %66 = vector.multi_reduction <add>, %65, %cst_36 [1] : vector<8x16xf32> to vector<8xf32>
    %67 = vector.shape_cast %66 : vector<8xf32> to vector<8x1xf32>
    %cst_37 = arith.constant 1.600000e+01 : f32
    %68 = vector.broadcast %cst_37 : f32 to vector<8x1xf32>
    %69 = arith.divf %67, %68 : vector<8x1xf32>
    %70 = vector.broadcast %69 : vector<8x1xf32> to vector<8x16xf32>
    %71 = arith.subf %65, %70 : vector<8x16xf32>
    %72 = arith.mulf %71, %71 : vector<8x16xf32>
    %cst_38 = arith.constant dense<0.000000e+00> : vector<8xf32>
    %73 = vector.multi_reduction <add>, %72, %cst_38 [1] : vector<8x16xf32> to vector<8xf32>
    %74 = vector.shape_cast %73 : vector<8xf32> to vector<8x1xf32>
    %cst_39 = arith.constant 1.600000e+01 : f32
    %75 = vector.broadcast %cst_39 : f32 to vector<8x1xf32>
    %76 = arith.divf %74, %75 : vector<8x1xf32>
    %77 = vector.broadcast %69 : vector<8x1xf32> to vector<8x16xf32>
    %78 = arith.subf %65, %77 : vector<8x16xf32>
    %cst_40 = arith.constant 9.99999974E-6 : f32
    %79 = vector.broadcast %cst_40 : f32 to vector<8x1xf32>
    %80 = arith.addf %76, %79 : vector<8x1xf32>
    %81 = math.rsqrt %80 : vector<8x1xf32>
    %82 = vector.broadcast %81 : vector<8x1xf32> to vector<8x16xf32>
    %83 = arith.mulf %78, %82 : vector<8x16xf32>
    %c0_41 = arith.constant 0 : index
    %c0_42 = arith.constant 0 : index
    %84 = vector.load %arg12[%c0_41, %c0_42] : memref<1x16xf32, #tpu.memory_space<vmem>>, vector<1x16xf32>
    %85 = vector.broadcast %84 : vector<1x16xf32> to vector<8x16xf32>
    %86 = arith.mulf %83, %85 : vector<8x16xf32>
    %c0_43 = arith.constant 0 : index
    %c0_44 = arith.constant 0 : index
    %87 = vector.load %arg13[%c0_43, %c0_44] : memref<1x16xf32, #tpu.memory_space<vmem>>, vector<1x16xf32>
    %88 = vector.broadcast %87 : vector<1x16xf32> to vector<8x16xf32>
    %89 = arith.addf %86, %88 : vector<8x16xf32>
    %c0_45 = arith.constant 0 : index
    %c0_46 = arith.constant 0 : index
    %90 = vector.load %arg14[%c0_45, %c0_46] : memref<16x32xf32, #tpu.memory_space<vmem>>, vector<16x32xf32>
    %cst_47 = arith.constant dense<0.000000e+00> : vector<8x32xf32>
    %91 = tpu.matmul %89, %90, %cst_47 {dimension_numbers = #tpu.dot_dimension_numbers<[1], [0], [0], [1], [0, 0, 1, 1], [], []>} : vector<8x16xf32>, vector<16x32xf32>, vector<8x32xf32> -> vector<8x32xf32>
    %c0_48 = arith.constant 0 : index
    %c0_49 = arith.constant 0 : index
    %92 = vector.load %arg15[%c0_48, %c0_49] : memref<1x32xf32, #tpu.memory_space<vmem>>, vector<1x32xf32>
    %93 = vector.broadcast %92 : vector<1x32xf32> to vector<8x32xf32>
    %94 = arith.addf %91, %93 : vector<8x32xf32>
    %cst_50 = arith.constant 0.000000e+00 : f32
    %95 = vector.broadcast %cst_50 : f32 to vector<8x32xf32>
    %96 = arith.maximumf %94, %95 : vector<8x32xf32>
    %c0_51 = arith.constant 0 : index
    %c0_52 = arith.constant 0 : index
    %97 = vector.load %arg16[%c0_51, %c0_52] : memref<32x16xf32, #tpu.memory_space<vmem>>, vector<32x16xf32>
    %cst_53 = arith.constant dense<0.000000e+00> : vector<8x16xf32>
    %98 = tpu.matmul %96, %97, %cst_53 {dimension_numbers = #tpu.dot_dimension_numbers<[1], [0], [0], [1], [0, 0, 1, 1], [], []>} : vector<8x32xf32>, vector<32x16xf32>, vector<8x16xf32> -> vector<8x16xf32>
    %c0_54 = arith.constant 0 : index
    %c0_55 = arith.constant 0 : index
    %99 = vector.load %arg17[%c0_54, %c0_55] : memref<1x16xf32, #tpu.memory_space<vmem>>, vector<1x16xf32>
    %100 = vector.broadcast %99 : vector<1x16xf32> to vector<8x16xf32>
    %101 = arith.addf %98, %100 : vector<8x16xf32>
    %102 = arith.addf %89, %101 : vector<8x16xf32>
    %cst_56 = arith.constant dense<0.000000e+00> : vector<8xf32>
    %103 = vector.multi_reduction <add>, %102, %cst_56 [1] : vector<8x16xf32> to vector<8xf32>
    %104 = vector.shape_cast %103 : vector<8xf32> to vector<8x1xf32>
    %cst_57 = arith.constant 1.600000e+01 : f32
    %105 = vector.broadcast %cst_57 : f32 to vector<8x1xf32>
    %106 = arith.divf %104, %105 : vector<8x1xf32>
    %107 = vector.broadcast %106 : vector<8x1xf32> to vector<8x16xf32>
    %108 = arith.subf %102, %107 : vector<8x16xf32>
    %109 = arith.mulf %108, %108 : vector<8x16xf32>
    %cst_58 = arith.constant dense<0.000000e+00> : vector<8xf32>
    %110 = vector.multi_reduction <add>, %109, %cst_58 [1] : vector<8x16xf32> to vector<8xf32>
    %111 = vector.shape_cast %110 : vector<8xf32> to vector<8x1xf32>
    %cst_59 = arith.constant 1.600000e+01 : f32
    %112 = vector.broadcast %cst_59 : f32 to vector<8x1xf32>
    %113 = arith.divf %111, %112 : vector<8x1xf32>
    %114 = vector.broadcast %106 : vector<8x1xf32> to vector<8x16xf32>
    %115 = arith.subf %102, %114 : vector<8x16xf32>
    %cst_60 = arith.constant 9.99999974E-6 : f32
    %116 = vector.broadcast %cst_60 : f32 to vector<8x1xf32>
    %117 = arith.addf %113, %116 : vector<8x1xf32>
    %118 = math.rsqrt %117 : vector<8x1xf32>
    %119 = vector.broadcast %118 : vector<8x1xf32> to vector<8x16xf32>
    %120 = arith.mulf %115, %119 : vector<8x16xf32>
    %c0_61 = arith.constant 0 : index
    %c0_62 = arith.constant 0 : index
    %121 = vector.load %arg18[%c0_61, %c0_62] : memref<1x16xf32, #tpu.memory_space<vmem>>, vector<1x16xf32>
    %122 = vector.broadcast %121 : vector<1x16xf32> to vector<8x16xf32>
    %123 = arith.mulf %120, %122 : vector<8x16xf32>
    %c0_63 = arith.constant 0 : index
    %c0_64 = arith.constant 0 : index
    %124 = vector.load %arg19[%c0_63, %c0_64] : memref<1x16xf32, #tpu.memory_space<vmem>>, vector<1x16xf32>
    %125 = vector.broadcast %124 : vector<1x16xf32> to vector<8x16xf32>
    %126 = arith.addf %123, %125 : vector<8x16xf32>
    %c0_65 = arith.constant 0 : index
    %c0_66 = arith.constant 0 : index
    %127 = vector.load %arg20[%c0_65, %c0_66] : memref<16x32xf32, #tpu.memory_space<vmem>>, vector<16x32xf32>
    %cst_67 = arith.constant dense<0.000000e+00> : vector<8x32xf32>
    %128 = tpu.matmul %126, %127, %cst_67 {dimension_numbers = #tpu.dot_dimension_numbers<[1], [0], [0], [1], [0, 0, 1, 1], [], []>} : vector<8x16xf32>, vector<16x32xf32>, vector<8x32xf32> -> vector<8x32xf32>
    %c0_68 = arith.constant 0 : index
    %c0_69 = arith.constant 0 : index
    %129 = vector.load %arg21[%c0_68, %c0_69] : memref<1x32xf32, #tpu.memory_space<vmem>>, vector<1x32xf32>
    %130 = vector.broadcast %129 : vector<1x32xf32> to vector<8x32xf32>
    %131 = arith.addf %128, %130 : vector<8x32xf32>
    %132 = vector.shape_cast %131 : vector<8x32xf32> to vector<1x8x32xf32>
    %c0_70 = arith.constant 0 : index
    %c0_71 = arith.constant 0 : index
    %c0_72 = arith.constant 0 : index
    %133 = vector.load %arg22[%c0_70, %c0_71, %c0_72] : memref<1x8x32xf32, #tpu.memory_space<vmem>>, vector<1x8x32xf32>
    tpu.vector_store %arg22[%c0_70, %c0_71, %c0_72], %132 {strides = array<i32>} : memref<1x8x32xf32, #tpu.memory_space<vmem>>, vector<1x8x32xf32>,
    return
  }
  func.func @transform_0(%arg0: i32) -> (i32, i32, i32) {
    %c0_i32 = arith.constant 0 : i32
    %c0_i32_0 = arith.constant 0 : i32
    %c0_i32_1 = arith.constant 0 : i32
    return %arg0, %c0_i32, %c0_i32_0 : i32, i32, i32
  }
  func.func @transform_1(%arg0: i32) -> (i32, i32, i32) {
    %c0_i32 = arith.constant 0 : i32
    %c0_i32_0 = arith.constant 0 : i32
    %c0_i32_1 = arith.constant 0 : i32
    return %arg0, %c0_i32, %c0_i32_0 : i32, i32, i32
  }
  func.func @transform_2(%arg0: i32) -> (i32, i32, i32) {
    %c0_i32 = arith.constant 0 : i32
    %c0_i32_0 = arith.constant 0 : i32
    %c0_i32_1 = arith.constant 0 : i32
    return %arg0, %c0_i32, %c0_i32_0 : i32, i32, i32
  }
  func.func @transform_3(%arg0: i32) -> (i32, i32) {
    %c0_i32 = arith.constant 0 : i32
    %c0_i32_0 = arith.constant 0 : i32
    %c0_i32_1 = arith.constant 0 : i32
    return %c0_i32, %c0_i32_0 : i32, i32
  }
  func.func @transform_4(%arg0: i32) -> (i32, i32) {
    %c0_i32 = arith.constant 0 : i32
    %c0_i32_0 = arith.constant 0 : i32
    %c0_i32_1 = arith.constant 0 : i32
    return %c0_i32, %c0_i32_0 : i32, i32
  }
  func.func @transform_5(%arg0: i32) -> (i32, i32) {
    %c0_i32 = arith.constant 0 : i32
    %c0_i32_0 = arith.constant 0 : i32
    %c0_i32_1 = arith.constant 0 : i32
    return %c0_i32, %c0_i32_0 : i32, i32
  }
  func.func @transform_6(%arg0: i32) -> (i32, i32) {
    %c0_i32 = arith.constant 0 : i32
    %c0_i32_0 = arith.constant 0 : i32
    %c0_i32_1 = arith.constant 0 : i32
    return %c0_i32, %c0_i32_0 : i32, i32
  }
  func.func @transform_7(%arg0: i32) -> (i32, i32) {
    %c0_i32 = arith.constant 0 : i32
    %c0_i32_0 = arith.constant 0 : i32
    %c0_i32_1 = arith.constant 0 : i32
    return %c0_i32, %c0_i32_0 : i32, i32
  }
  func.func @transform_8(%arg0: i32) -> (i32, i32) {
    %c0_i32 = arith.constant 0 : i32
    %c0_i32_0 = arith.constant 0 : i32
    %c0_i32_1 = arith.constant 0 : i32
    return %c0_i32, %c0_i32_0 : i32, i32
  }
  func.func @transform_9(%arg0: i32) -> (i32, i32) {
    %c0_i32 = arith.constant 0 : i32
    %c0_i32_0 = arith.constant 0 : i32
    %c0_i32_1 = arith.constant 0 : i32
    return %c0_i32, %c0_i32_0 : i32, i32
  }
  func.func @transform_10(%arg0: i32) -> (i32, i32) {
    %c0_i32 = arith.constant 0 : i32
    %c0_i32_0 = arith.constant 0 : i32
    %c0_i32_1 = arith.constant 0 : i32
    return %c0_i32, %c0_i32_0 : i32, i32
  }
  func.func @transform_11(%arg0: i32) -> (i32, i32) {
    %c0_i32 = arith.constant 0 : i32
    %c0_i32_0 = arith.constant 0 : i32
    %c0_i32_1 = arith.constant 0 : i32
    return %c0_i32, %c0_i32_0 : i32, i32
  }
  func.func @transform_12(%arg0: i32) -> (i32, i32) {
    %c0_i32 = arith.constant 0 : i32
    %c0_i32_0 = arith.constant 0 : i32
    %c0_i32_1 = arith.constant 0 : i32
    return %c0_i32, %c0_i32_0 : i32, i32
  }
  func.func @transform_13(%arg0: i32) -> (i32, i32) {
    %c0_i32 = arith.constant 0 : i32
    %c0_i32_0 = arith.constant 0 : i32
    %c0_i32_1 = arith.constant 0 : i32
    return %c0_i32, %c0_i32_0 : i32, i32
  }
  func.func @transform_14(%arg0: i32) -> (i32, i32) {
    %c0_i32 = arith.constant 0 : i32
    %c0_i32_0 = arith.constant 0 : i32
    %c0_i32_1 = arith.constant 0 : i32
    return %c0_i32, %c0_i32_0 : i32, i32
  }
  func.func @transform_15(%arg0: i32) -> (i32, i32) {
    %c0_i32 = arith.constant 0 : i32
    %c0_i32_0 = arith.constant 0 : i32
    %c0_i32_1 = arith.constant 0 : i32
    return %c0_i32, %c0_i32_0 : i32, i32
  }
  func.func @transform_16(%arg0: i32) -> (i32, i32) {
    %c0_i32 = arith.constant 0 : i32
    %c0_i32_0 = arith.constant 0 : i32
    %c0_i32_1 = arith.constant 0 : i32
    return %c0_i32, %c0_i32_0 : i32, i32
  }
  func.func @transform_17(%arg0: i32) -> (i32, i32) {
    %c0_i32 = arith.constant 0 : i32
    %c0_i32_0 = arith.constant 0 : i32
    %c0_i32_1 = arith.constant 0 : i32
    return %c0_i32, %c0_i32_0 : i32, i32
  }
  func.func @transform_18(%arg0: i32) -> (i32, i32) {
    %c0_i32 = arith.constant 0 : i32
    %c0_i32_0 = arith.constant 0 : i32
    %c0_i32_1 = arith.constant 0 : i32
    return %c0_i32, %c0_i32_0 : i32, i32
  }
  func.func @transform_19(%arg0: i32) -> (i32, i32) {
    %c0_i32 = arith.constant 0 : i32
    %c0_i32_0 = arith.constant 0 : i32
    %c0_i32_1 = arith.constant 0 : i32
    return %c0_i32, %c0_i32_0 : i32, i32
  }
  func.func @transform_20(%arg0: i32) -> (i32, i32) {
    %c0_i32 = arith.constant 0 : i32
    %c0_i32_0 = arith.constant 0 : i32
    %c0_i32_1 = arith.constant 0 : i32
    return %c0_i32, %c0_i32_0 : i32, i32
  }
  func.func @transform_21(%arg0: i32) -> (i32, i32, i32) {
    %c0_i32 = arith.constant 0 : i32
    %c0_i32_0 = arith.constant 0 : i32
    %c0_i32_1 = arith.constant 0 : i32
    return %arg0, %c0_i32, %c0_i32_0 : i32, i32, i32
  }
}

</mosaic_0001>

<bundles_post_ra>
// kernel: tpu_custom_call.1
= control target key start
LH: loop header
LB: loop body
LE: loop exit
PB: predicated region body
PF: predicated region fallthrough
CT: control target
= control target key end

     0   :  { %s2550_s0 = inlined_call_operand.vmem [shape: f32[2,8,32], index: 0, kind: input, shape index: {}]   ;;  %s2551_s1 = inlined_call_operand.vmem [shape: f32[2,8,16], index: 1, kind: input, shape index: {}]   ;;  %s2552_s2 = inlined_call_operand.hbm [shape: f32[2,1,8], index: 2, kind: input, shape index: {}]   ;;  %s2553_s3 = inlined_call_operand.vmem [shape: f32[32,16], index: 3, kind: input, shape index: {}]   ;;  %s2554_s4 = inlined_call_operand.vmem [shape: f32[1,16], index: 4, kind: input, shape index: {}]   ;;  %s2555_s5 = inlined_call_operand.vmem [shape: f32[16,16], index: 5, kind: input, shape index: {}]   ;;  %s2556_s6 = inlined_call_operand.hbm [shape: f32[1,16], index: 6, kind: input, shape index: {}]   ;;  %s2557_s7 = inlined_call_operand.vmem [shape: f32[16,32], index: 7, kind: input, shape index: {}]   ;;  %s2558_s8 = inlined_call_operand.hbm [shape: f32[1,32], index: 8, kind: input, shape index: {}]   ;;  %s2559_s9 = inlined_call_operand.vmem [shape: f32[16,16], index: 9, kind: input, shape index: {}]   ;;  %s2560_s10 = inlined_call_operand.hbm [shape: f32[1,16], index: 10, kind: input, shape index: {}]   ;;  %s2561_s11 = inlined_call_operand.hbm [shape: f32[1,16], index: 11, kind: input, shape index: {}]   ;;  %s2562_s12 = inlined_call_operand.hbm [shape: f32[1,16], index: 12, kind: input, shape index: {}]   ;;  %s2563_s13 = inlined_call_operand.hbm [shape: f32[16,32], index: 13, kind: input, shape index: {}]   ;;  %s2564_s14 = inlined_call_operand.hbm [shape: f32[1,32], index: 14, kind: input, shape index: {}]   ;;  %s2565_s15 = inlined_call_operand.vmem [shape: f32[32,16], index: 15, kind: input, shape index: {}]   ;;  %s2566_s16 = inlined_call_operand.hbm [shape: f32[1,16], index: 16, kind: input, shape index: {}]   ;;  %s2567_s17 = inlined_call_operand.hbm [shape: f32[1,16], index: 17, kind: input, shape index: {}]   ;;  %s2568_s18 = inlined_call_operand.hbm [shape: f32[1,16], index: 18, kind: input, shape index: {}]   ;;  %s2569_s19 = inlined_call_operand.vmem [shape: f32[16,32], index: 19, kind: input, shape index: {}]   ;;  %s2570_s20 = inlined_call_operand.vmem [shape: f32[1,32], index: 20, kind: input, shape index: {}]   ;;  %s2571_s21 = inlined_call_operand.hbm [shape: f32[2,8,32], index: 21, kind: output, shape index: {}]  }
   0x1   :  { %2578 = sst [smem:[#allocation28_spill]] %s2550_s0 }
   0x2   :  { %2579 = sst [smem:[#allocation29_spill]] %s2551_s1 }
   0x3   :  { %2580 = sst [smem:[#allocation30_spill]] %s2552_s2 }
   0x4   :  { %2581 = sst [smem:[#allocation31_spill]] %s2553_s3 }
   0x5   :  { %2582 = sst [smem:[#allocation32_spill]] %s2554_s4 }
   0x6   :  { %2583 = sst [smem:[#allocation33_spill]] %s2555_s5 }
   0x7   :  { %2584 = sst [smem:[#allocation34_spill]] %s2556_s6 }
   0x8   :  { %2585 = sst [smem:[#allocation35_spill]] %s2558_s8 }
   0x9   :  { %2586 = sst [smem:[#allocation36_spill]] %s2560_s10 }
   0xa   :  { %2587 = sst [smem:[#allocation37_spill]] %s2561_s11 }
   0xb   :  { %2588 = sst [smem:[#allocation38_spill]] %s2562_s12 }
   0xc   :  { %2589 = sst [smem:[#allocation39_spill]] %s2563_s13 }
   0xd   :  { %2590 = sst [smem:[#allocation40_spill]] %s2564_s14 }
   0xe   :  { %2591 = sst [smem:[#allocation41_spill]] %s2566_s16 }
   0xf   :  { %2592 = sst [smem:[#allocation42_spill]] %s2567_s17 }
  0x10   :  { %2593 = sst [smem:[#allocation43_spill]] %s2569_s19 }
  0x11   :  { %2594 = sst [smem:[#allocation44_spill]] %s2570_s20 }
  0x12   :  { %2595 = sst [smem:[#allocation45_spill]] %s2571_s21 }
  0x13   :  { %26 = vsyncpa [#allocation3], 0 }
  0x14   :  { %28 = vsyncpa [#allocation3 + $0x1], 0 }
  0x15   :  { %29 = vsyncpa [#allocation6], 0 }
  0x16   :  { %30 = vsyncpa [#allocation9], 0 }
  0x17   :  { %31 = vsyncpa [#allocation12], 0 }
  0x18   :  { %32 = vsyncpa [#allocation15], 0 }
  0x19   :  { %33 = vsyncpa [#allocation18], 0 }
  0x1a   :  { %34 = vsyncpa [#allocation4], 0 }
  0x1b   :  { %36 = vsyncpa [#allocation4 + $0x1], 0  ;;  %s2246_s2 = smov 0   ;;  %s2248_s25 = smov 0  }
  0x1c   :  { %s2250_s26 = smov 0   ;;  %s2252_s27 = smov 0  }
  0x1d LB: > { %s2596_s6 = sld [smem:[#allocation34_spill]]  ;;  %s2270_s0 = sadd.s32 4294967295, %s2117_s27   ;;  %s2117_s27 = sphi %s2252_s27, %s2626_s27   ;;  %s2113_s26 = sphi %s2250_s26, %s2625_s26   ;;  %s2109_s25 = sphi %s2248_s25, %s2624_s25   ;;  %s2105_s2 = sphi %s2246_s2, %s2623_s2  }
  0x1e   : > { %p1478_p0 = scmp.ge.s32.totalorder %s2117_s27, 1  ;;  %p115_p1 = scmp.eq.s32.totalorder %s2270_s0, 0 }
  0x1f   : > { %p529_p2 = scmp.lt.s32.totalorder %s2117_s27, 3  ;;  %s2119_s30 = smov [#allocation5]  }
  0x20   : > { %s552_s5 = sshll.u32 %s2119_s30, 4  ;;  %s2598_s10 = sld [smem:[#allocation36_spill]]  ;;  %s553_s5 = int_to_ptr.vmem [resolvable:$true] %s552_s5 }
  0x21   : > { %p2275_p3 = pnand %p1478_p0, %p529_p2  ;;  %s2120_s3 = smov [#allocation8]  }
  0x22   : > { %s582_s28 = sshll.u32 %s2120_s3, 4  ;;  %s2600_s12 = sld [smem:[#allocation38_spill]]  ;;  %s583_s28 = int_to_ptr.vmem [resolvable:$true] %s582_s28 }
  0x23   : > { %s550_s29 = sshll.u32 %s2596_s6, 4  ;;  %p1565_p5 = pneg %p2275_p3  ;;  %s551_s29 = int_to_ptr.hbm [resolvable:$true] %s550_s29 }
  0x24   : > { %s2601_s14 = sld [smem:[#allocation40_spill]]  ;;  %s2121_s21 = smov [#allocation11]  }
  0x25   : > { %p2287_p6 = pnand %p1565_p5, %p115_p1  ;;  %s606_s19 = sshll.u32 %s2121_s21, 4  ;;  %s607_s19 = int_to_ptr.vmem [resolvable:$true] %s606_s19 }
  0x26   : > { %s580_s1 = sshll.u32 %s2598_s10, 4  ;;  %s2122_s3 = smov [#allocation14]   ;;  %s581_s1 = int_to_ptr.hbm [resolvable:$true] %s580_s1 }
  0x27   : > { %1568 = dma.hbm_to_vmem [thread:$0]  (!%p2287_p6), %s551_s29, 16, %s553_s5, [#allocation6]  }
  0x28   : > { %s604_s20 = sshll.u32 %s2600_s12, 4  ;;  %s632_s6 = sshll.u32 %s2122_s3, 4  ;;  %s605_s20 = int_to_ptr.hbm [resolvable:$true] %s604_s20  ;;  %s633_s6 = int_to_ptr.vmem [resolvable:$true] %s632_s6 }
  0x29   : > { %1574 = dma.hbm_to_vmem [thread:$0]  (!%p2287_p6), %s581_s1, 16, %s583_s28, [#allocation9]  }
  0x2a   : > { %s630_s10 = sshll.u32 %s2601_s14, 4  ;;  %s2602_s17 = sld [smem:[#allocation42_spill]]  ;;  %s631_s10 = int_to_ptr.hbm [resolvable:$true] %s630_s10 }
  0x2b   : > { %1580 = dma.hbm_to_vmem [thread:$0]  (!%p2287_p6), %s605_s20, 16, %s607_s19, [#allocation12]  }
  0x2c   : > { %1586 = dma.hbm_to_vmem [thread:$0]  (!%p2287_p6), %s631_s10, 16, %s633_s6, [#allocation15]  }
  0x2d   : > { %s2603_s8 = sld [smem:[#allocation35_spill]]  ;;  %s2123_s21 = smov [#allocation17]  }
  0x2e   : > { %s659_s22 = sshll.u32 %s2123_s21, 4  ;;  %s2124_s19 = smov [#allocation7]   ;;  %s660_s22 = int_to_ptr.vmem [resolvable:$true] %s659_s22 }
  0x2f   : > { %s567_s20 = sshll.u32 %s2124_s19, 4  ;;  %s2604_s11 = sld [smem:[#allocation37_spill]]  ;;  %s568_s20 = int_to_ptr.vmem [resolvable:$true] %s567_s20 }
  0x30   : > { %s657_s29 = sshll.u32 %s2602_s17, 4  ;;  %s2605_s13 = sld [smem:[#allocation39_spill]]  ;;  %s658_s29 = int_to_ptr.hbm [resolvable:$true] %s657_s29 }
  0x31   : > { %1592 = dma.hbm_to_vmem [thread:$0]  (!%p2287_p6), %s658_s29, 16, %s660_s22, [#allocation18]  }
  0x32   : > { %s2125_s5 = smov [#allocation10]   ;;  %s2126_s29 = smov [#allocation13]  }
  0x33   : > { %s565_s28 = sshll.u32 %s2603_s8, 4  ;;  %s594_s1 = sshll.u32 %s2125_s5, 4  ;;  %s566_s28 = int_to_ptr.hbm [resolvable:$true] %s565_s28  ;;  %s595_s1 = int_to_ptr.vmem [resolvable:$true] %s594_s1 }
  0x34   : > { %1571 = dma.hbm_to_vmem [thread:$0]  (!%p2287_p6), %s566_s28, 16, %s568_s20, [#allocation6]  }
  0x35   : > { %s592_s3 = sshll.u32 %s2604_s11, 4  ;;  %s617_s21 = sshll.u32 %s2126_s29, 4  ;;  %s593_s3 = int_to_ptr.hbm [resolvable:$true] %s592_s3  ;;  %s618_s21 = int_to_ptr.vmem [resolvable:$true] %s617_s21 }
  0x36   : > { %s615_s30 = sshll.u32 %s2605_s13, 4  ;;  %s2127_s22 = smov 128   ;;  %s616_s30 = int_to_ptr.hbm [resolvable:$true] %s615_s30 }
  0x37   : > { %1577 = dma.hbm_to_vmem [thread:$0]  (!%p2287_p6), %s593_s3, 16, %s595_s1, [#allocation9]  }
  0x38   : > { %s2128_s19 = smov 8   ;;  %s2606_s16 = sld [smem:[#allocation41_spill]] }
  0x39   : > { %1583 = dma.hbm_to_vmem [thread:$0]  (!%p2287_p6), %s616_s30, 256, %s618_s21, [#allocation12], %s2127_s22, %s2127_s22, %s2128_s19  }
  0x3a   : > { %s2129_s23 = smov [#allocation16]   ;;  %s669_s5 = sshll.u32 %s2568_s18, 4  ;;  %s670_s5 = int_to_ptr.hbm [resolvable:$true] %s669_s5 }
  0x3b   : > { %s647_s3 = sshll.u32 %s2129_s23, 4  ;;  %s2130_s30 = smov [#allocation19]   ;;  %s648_s3 = int_to_ptr.vmem [resolvable:$true] %s647_s3 }
  0x3c   : > { %s671_s1 = sshll.u32 %s2130_s30, 4  ;;  %s1477_s29 = sadd.s32 4294967294, %s2117_s27   ;;  %s672_s1 = int_to_ptr.vmem [resolvable:$true] %s671_s1 }
  0x3d   : > { %1595 = dma.hbm_to_vmem [thread:$0]  (!%p2287_p6), %s670_s5, 16, %s672_s1, [#allocation18]  }
  0x3e   : > { %s645_s12 = sshll.u32 %s2606_s16, 4  ;;  %s2337_s21 = sadd.s32 1, %s2117_s27   ;;  %s646_s12 = int_to_ptr.hbm [resolvable:$true] %s645_s12 }
  0x3f   : > { %1589 = dma.hbm_to_vmem [thread:$0]  (!%p2287_p6), %s646_s12, 16, %s648_s3, [#allocation15]  }
  0x40   : > { %s98_s22 = ssub.s32 %s2117_s27, %s2337_s21  ;;  %s101_s19 = sadd.s32 1, %s2113_s26 }
  0x41   : > { %p99_p7 = scmp.eq.s32.totalorder %s98_s22, 0  ;;  %p108_p8 = scmp.ne.s32.totalorder %s2113_s26, %s2109_s25 }
  0x42   : > { %p109_p9 = scmp.eq.s32.totalorder %s2117_s27, 0  ;;  %p114_p10 = scmp.ne.s32.totalorder %s2109_s25, %s2105_s2 }
  0x43   : > { %s2348_s28 = scalar_select %p99_p7, %s2113_s26, %s101_s19  }
  0x44   : > { %p2350_p11 = por %p109_p9, %p108_p8  ;;  %p2356_p12 = por %p115_p1, %p114_p10 }
  0x45   : > { %p516_p13 = scmp.eq.s32.totalorder %s2270_s0, 1  ;;  %p522_p0 = scmp.eq.s32.totalorder %s1477_s29, 1 }
  0x46   : > { %p1614_p2 = scmp.lt.s32.totalorder %s2117_s27, 2  ;;  %s702_s12 = sand.u32 1, %s2113_s26  }
  0x47   : > { %p2363_p5 = por %p516_p13, %p108_p8  ;;  %p2367_p6 = por %p522_p0, %p114_p10 }
  0x48   : > { %s2611_s5 = sld [smem:[#allocation30_spill]]  ;;  %s705_s1 = scalar_lea.vmem [#allocation2], %s702_s12 }
  0x49   : > { %s712_s22 = sshll.u32 %s705_s1, 4  ;;  %p2377_p7 = pnand %p1614_p2, %p2350_p11  ;;  %s713_s22 = int_to_ptr.vmem [resolvable:$true] %s712_s22 }
  0x4a   : > { %s703_s8 = scalar_lea.sflag [#allocation3], %s702_s12 }
  0x4b   : > { %p2005_p9 = pneg %p2377_p7 }
  0x4e   : > { %s708_s30 = scalar_lea.hbm %s2611_s5, %s2117_s27 }
  0x4f   : > { %s710_s19 = sshll.u32 %s708_s30, 4  ;;  %s2008_s30 = scalar_lea.hbm %s2611_s5, 2  ;;  %s711_s19 = int_to_ptr.hbm [resolvable:$true] %s710_s19 }
  0x50   : > { %s2001_s11 = sshra.s32 %s711_s19, 4  ;;  %s2002_s11 = int_to_ptr.hbm [resolvable:$true] %s2001_s11 }
  0x51   : > { %s2003_s13 = scalar_lea.hbm %s2002_s11, 1  ;;  %p2009_p11 = scmp.lt.s32.totalorder %s2002_s11, %s2611_s5 }
  0x52   : > { %p2004_p8 = scmp.ne.s32.totalorder %s2002_s11, %s2003_s13  ;;  %p2010_p0 = scmp.lt.s32.totalorder %s2008_s30, %s2003_s13 }
  0x54   : > { %p2006_p10 = pnand %p2005_p9, %p2004_p8  ;;  %p2011_p2 = por %p2010_p0, %p2009_p11 }
  0x56   : > { %p2007_p13 = pneg %p2006_p10 }
  0x58   : > { %p2012_p4 = pnand %p2011_p2, %p2007_p13 }
  0x5a   : > { %2015 = shalt.err (!%p2012_p4)
}
  0x5b   : > { %1599 = dma.hbm_to_vmem [thread:$0]  (!%p2377_p7), %s711_s19, 16, %s713_s22, %s703_s8  }
  0x5c   : > { %721 = sbr.rel (%p2275_p3) target bundleno = 2177 (0x881), region = 104  ;;  %s2394_s12 = sand.u32 (!%p2275_p3), 1, %s2109_s25  }
  0x5d   : > { %s724_s10 = scalar_lea.sflag (!%p2275_p3), [#allocation3], %s2394_s12 }
  0x61   : > { %2076 = dma.done.wait (%p2356_p12), %s724_s10, 16  }
  0x62   : > { %2078 = vsyncadd (%p2356_p12), %s724_s10, 4294967280 }
  0x63   : > { %2080 = dma.done.wait (%p115_p1), [#allocation6], 32  }
  0x64   : > { %2082 = vsyncadd (%p115_p1), [#allocation6], 4294967264 }
  0x65   : > { %2084 = dma.done.wait (%p115_p1), [#allocation9], 32  }
  0x66   : > { %2086 = vsyncadd (%p115_p1), [#allocation9], 4294967264 }
  0x67   : > { %2088 = dma.done.wait (%p115_p1), [#allocation12], 272  }
  0x68   : > { %2090 = vsyncadd (%p115_p1), [#allocation12], 4294967024 }
  0x69   : > { %2092 = dma.done.wait (%p115_p1), [#allocation15], 32  }
  0x6a   : > { %2094 = vsyncadd (%p115_p1), [#allocation15], 4294967264 }
  0x6b   : > { %2096 = dma.done.wait (%p115_p1), [#allocation18], 32  }
  0x6c   : > { %2098 = vsyncadd (%p115_p1), [#allocation18], 4294967264  ;;  %p843_p3 = scmp.lt.s32.totalorder %s2270_s0, 1  ;;  %s2613_s24 = sld [smem:[#allocation29_spill]]  ;;  %v917_v3 = vld [vmem:[%s2557_s7 + $0x8] sm:$0xff]  ;;  %v916_v5 = vld [vmem:[%s2557_s7] sm:$0xff] }
  0x6d   : > { %s2614_s30 = sld [smem:[#allocation31_spill]]  ;;  %939 = vmatpush.msra.mxu2 %v917_v3  ;;  %vm891_vm0 = vcmask 130048   ;;  %vm860_vm1 = vcmask 261120   ;;  %v1676_v12 = vld [vmem:[#allocation7] ss:$0 sm:$0xff]  ;;  %vm949_vm2 = vcmask 64512  }
  0x6e   : > { %s844_s8 = scalar_select %p843_p3, %s2270_s0, 1  ;;  %v1677_v18 = vld [vmem:[#allocation5] ss:$0 sm:$0xff]  ;;  %v1084_v47 = vld [vmem:[%s2559_s9 + $0x8] sm:$0xff]  ;;  %v1679_v53 = vld [vmem:[#allocation8] ss:$0 sm:$0xff] }
  0x6f   : > { %s2615_s5 = sld [smem:[#allocation28_spill]]  ;;  %940 = vmatpush.msra.mxu2 %v916_v5  ;;  %s2131_s20 = smov 120   ;;  %v1083_v49 = vld [vmem:[%s2559_s9] sm:$0xff]  ;;  %v2135_v58 = vmov 16.0  }
  0x70   : > { %s1502_s11 = sshll.u32 %s844_s8, 3  ;;  %s2617_s1 = sld [smem:[#allocation32_spill]] }
  0x71   : > { %s2618_s10 = scalar_lea.vmem [#allocation2], %s2394_s12  ;;  %s2132_s8 = smov 112  }
  0x72   : > { %s850_s22 = scalar_lea.vmem %s2613_s24, %s1502_s11  ;;  %v1678_v22 = vld [vmem:[%s2618_s10] ss:$0 sm:$0xff]  ;;  %s2133_s13 = smov 104  }
  0x73   : > { %v855_v0 = vld [vmem:[%s2614_s30 + $0x18] sm:$0xff]  ;;  %v854_v1 = vld [vmem:[%s2614_s30 + $0x10] sm:$0xff]  ;;  %v853_v2 = vld [vmem:[%s2614_s30 + $0x8] sm:$0xff]  ;;  %s2134_s19 = smov 8   ;;  %s2619_s4 = sld [smem:[#allocation43_spill]] }
  0x74   : > { %876 = vmatpush.msra.mxu0 %v855_v0  ;;  %v852_v4 = vld [vmem:[%s2614_s30] sm:$0xff]  ;;  %s1501_s29 = sshll.u32 %s2394_s12, 3  ;;  %s1518_s16 = sshll.u32 %s2270_s0, 3 }
  0x75   : > { %s846_s14 = scalar_lea.vmem %s2615_s5, %s1502_s11  ;;  %v915_v6 = vld [vmem:[%s850_s22] sm:$0xff]  ;;  %s2616_s5 = sld [smem:[#allocation33_spill]] }
  0x76   : > { %877 = vmatpush.msra.mxu0 %v854_v1  ;;  %v851_v7 = vld [vmem:[%s846_s14] sm:$0xff]  ;;  %1506 = vmatmul.msk.f32.vlgmr.msra.gmra.mxu2 %vm891_vm0, %v915_v6  ;;  %v1153_v6 = vld [vmem:[#allocation13 + $0x8] sm:$0xff]  ;;  %s2620_s11 = sld [smem:[#allocation45_spill]]  ;;  %s842_s10 = scalar_lea.vmem [#allocation20], %s1501_s29 }
  0x77   : > { %v1675_v10 = vld [vmem:[%s2617_s1] ss:$0 sm:$0xff]  ;;  %s1277_s24 = scalar_lea.sflag [#allocation4], %s2394_s12 }
  0x78   : > { %878 = vmatpush.msra.mxu0 %v853_v2 }
  0x7a   : > { %879 = vmatpush.msra.mxu0 %v852_v4 }
  0x7b   : > { %1504 = vmatmul.msk.f32.vlgmr.msra.gmra.mxu0 %vm860_vm1, %v851_v7  ;;  %v886_v8 = vld [vmem:[%s2616_s5 + $0x8] sm:$0xff]  ;;  %v885_v9 = vld [vmem:[%s2616_s5] sm:$0xff] }
  0x7c   : > { %909 = vmatpush.msra.mxu1 %v886_v8  ;;  %1106 = vmatpush.msrb.mxu0 %v1084_v47  ;;  %v1152_v7 = vld [vmem:[#allocation13] sm:$0xff]  ;;  %v1185_v8 = vld [vmem:[%s2565_s15 + $0x18] sm:$0xff]  ;;  %s1287_s22 = scalar_lea.hbm %s2620_s11, %s1518_s16  ;;  %s2051_s29 = scalar_lea.hbm %s2620_s11, 16 }
  0x7e   : > { %910 = vmatpush.msra.mxu1 %v885_v9  ;;  %1107 = vmatpush.msrb.mxu0 %v1083_v49 }
  0xf8   : > { %v881_v11 = vpop.f32.mrf.mxu0 }
  0xf9   : > { %v2459_v13 = vadd.f32 %v1675_v10, %v881_v11  ;;  %v942_v15 = vpop.f32.mrf.mxu2 }
  0xfa   : > { %v943_v16 = vadd.f32 %v1676_v12, %v942_v15 }
  0xfb   : > { %v884_v14 = vmax.f32 %v2459_v13, 0.0 }
  0xfc   : > { %1015 = vrot.lane.b32.xlu0 %v943_v16, %s2131_s20  ;;  %1507 = vmatpush.xpose.msk.msra.mxu3 %vm949_vm2, %v943_v16 }
  0xfd   : > { %1505 = vmatmul.msk.f32.vlgmr.msra.gmra.mxu1 %vm891_vm0, %v884_v14 }
 0x16e   : > { %v1016_v17 = vpop.permute.xlu0 %1015 }
 0x16f   : > { %1510 = vmatpush.xpose.msk.msrb.mxu2 %vm949_vm2, %v1016_v17 }
 0x173   : > { %1205 = vmatpush.msra.mxu2 %v1185_v8 }
 0x17a   : > { %v912_v19 = vpop.f32.mrf.mxu1 }
 0x17b   : > { %v913_v20 = vadd.f32 %v1677_v18, %v912_v19  ;;  %v1680_v18 = vld [vmem:[#allocation10] ss:$0 sm:$0xff] }
 0x17d   : > { %1013 = vrot.lane.b32.xlu0 %v913_v20, %s2131_s20  ;;  %1508 = vmatmul.msk.f32.vlgmr.msra.gmra.mxu3 %vm949_vm2, %v913_v20  ;;  %s2621_s20 = sld [smem:[#allocation44_spill]] }
 0x1ef   : > { %v1014_v21 = vpop.permute.xlu0 %1013 }
 0x1f0   : > { %1511 = vmatmul.msk.f32.vlgmr.msrb.gmra.mxu2 %vm949_vm2, %v1014_v21  ;;  %v1681_v21 = vld [vmem:[#allocation11] ss:$0 sm:$0xff] }
 0x200   : > { %v973_v26 = vpop.f32.mrf.mxu3 }
 0x201   : > { %v974_v27 = vadd.f32 %v1678_v22, %v973_v26  ;;  %v1182_v26 = vld [vmem:[%s2565_s15] sm:$0xff] }
 0x203   : > { %v976_v28 = vsel %vm949_vm2, %v974_v27, -inf }
 0x273   : > { %v1038_v23 = vpop.f32.mrf.mxu2 }
 0x274   : > { %v1039_v24 = vadd.f32 %v1678_v22, %v1038_v23 }
 0x276   : > { %v1041_v25 = vsel %vm949_vm2, %v1039_v24, -inf }
 0x277   : > { %1042 = vmax.xlane.f32.xlu1 %v1041_v25  ;;  %v1183_v25 = vld [vmem:[%s2565_s15 + $0x8] sm:$0xff] }
 0x27f   : > { %977 = vmax.xlane.f32.xlu1 %v976_v28 }
 0x298   : > { %987 = vrot.lane.b32.xlu1 %v943_v16, %s2132_s8  ;;  %s1289_s8 = sshll.u32 %s842_s10, 4  ;;  %s1290_s8 = int_to_ptr.vmem [resolvable:$true] %s1289_s8 }
 0x2ea   : > { %v1043_v29 = vpop.xlane.xlu1 %1042 }
 0x2eb   : > { %v1044_v30 = vsub.f32 %v1039_v24, %v1043_v29  ;;  %v1184_v24 = vld [vmem:[%s2565_s15 + $0x10] sm:$0xff] }
 0x2ec   : > { %1206 = vmatpush.msra.mxu2 %v1184_v24 }
 0x2ed   : > { %v1045_v31 = vmul.f32 1.442695, %v1044_v30 }
 0x2ee   : > { %1207 = vmatpush.msra.mxu2 %v1183_v25 }
 0x2ef   : > { %1687 = vpow2.f32 %v1045_v31  ;;  %v1683_v31 = vld [vmem:[#allocation16] ss:$0 sm:$0xff] }
 0x2f0   : > { %1208 = vmatpush.msra.mxu2 %v1182_v26 }
 0x2f2   : > { %v978_v32 = vpop.xlane.xlu1 %977 }
 0x2f3   : > { %v979_v33 = vsub.f32 %v974_v27, %v978_v32  ;;  %v1682_v27 = vld [vmem:[#allocation14] ss:$0 sm:$0xff] }
 0x2f5   : > { %v1688_v34 = vpop.eup %1687  ;;  %v980_v35 = vmul.f32 1.442695, %v979_v33 }
 0x2f6   : > { %v1047_v36 = vsel %vm949_vm2, %v1688_v34, 0.0 }
 0x2f7   : > { %1689 = vpow2.f32 %v980_v35  ;;  %1048 = vadd.xlane.f32.xlu2 %v1047_v36 }
 0x2fd   : > { %v1690_v37 = vpop.eup %1689 }
 0x2fe   : > { %v982_v38 = vsel %vm949_vm2, %v1690_v37, 0.0 }
 0x2ff   : > { %983 = vadd.xlane.f32.xlu0 %v982_v38 }
 0x30a   : > { %v988_v39 = vpop.permute.xlu1 %987 }
 0x30b   : > { %1008 = vmatpush.msrb.mxu1 %v988_v39 }
 0x30d   : > { %1175 = vmatpush.msra.mxu1 %v1153_v6 }
 0x30f   : > { %1052 = vrot.lane.b32.xlu2 %v943_v16, %s2133_s13  ;;  %1176 = vmatpush.msra.mxu1 %v1152_v7  ;;  %s1291_s13 = sshll.u32 %s1287_s22, 4  ;;  %s1292_s13 = int_to_ptr.hbm [resolvable:$true] %s1291_s13 }
 0x310   : > { %s2045_s0 = sshra.s32 %s1292_s13, 4  ;;  %s2046_s0 = int_to_ptr.hbm [resolvable:$true] %s2045_s0 }
 0x311   : > { %p2052_p7 = scmp.lt.s32.totalorder %s2046_s0, %s2620_s11 }
 0x36a   : > { %v1049_v40 = vpop.xlane.xlu2 %1048 }
 0x36b   : > { %1691 = vrcp.f32 %v1049_v40 }
 0x371   : > { %v1692_v41 = vpop.eup %1691 }
 0x372   : > { %v1053_v42 = vpop.permute.xlu2 %1052  ;;  %v984_v43 = vpop.xlane.xlu0 %983  ;;  %v1051_v44 = vmul.f32 %v1692_v41, %v1688_v34  ;;  %v1247_v41 = vld [vmem:[%s2619_s4 + $0x8] sm:$0xff] }
 0x373   : > { %1693 = vrcp.f32 %v984_v43  ;;  %1073 = vmatpush.msrb.mxu3 %v1053_v42  ;;  %v1246_v42 = vld [vmem:[%s2619_s4] sm:$0xff] }
 0x374   : > { %1512 = vmatmul.msk.f32.vlgmr.msrb.gmra.mxu3 %vm949_vm2, %v1051_v44  ;;  %1695 = vrcp.f32 %v2135_v58  ;;  %v1686_v58 = vld [vmem:[%s2621_s20] ss:$0 sm:$0xff] }
 0x375   : > { %1269 = vmatpush.msra.mxu3 %v1247_v41 }
 0x377   : > { %1270 = vmatpush.msra.mxu3 %v1246_v42 }
 0x379   : > { %v1694_v45 = vpop.eup %1693 }
 0x37a   : > { %v986_v46 = vmul.f32 %v1694_v45, %v1690_v37  ;;  %v1696_v59 = vpop.eup %1695 }
 0x37b   : > { %v1117_v60 = vmul.f32 16.0, %v1696_v59  ;;  %vm1121_vm3 = vweird.f32 %v1696_v59 }
 0x37c   : > { %1509 = vmatmul.msk.f32.vlgmr.msrb.gmra.mxu1 %vm949_vm2, %v986_v46 }
 0x37d   : > { %v1118_v61 = vsub.f32 1.0, %v1117_v60 }
 0x37f   : > { %v1119_v62 = vmul.f32 %v1696_v59, %v1118_v61 }
 0x381   : > { %v1120_v63 = vadd.f32 %v1696_v59, %v1119_v62 }
 0x383   : > { %v1122_v0 = vsel %vm1121_vm3, %v1696_v59, %v1120_v63 }
 0x3f7   : > { %v1075_v48 = vpop.f32.mrf.mxu3 }
 0x3f8   : > { %1079 = vrot.lane.b32.xlu2 %v1075_v48, %s2134_s19  ;;  %s2047_s19 = scalar_lea.hbm %s2046_s0, 8 }
 0x3f9   : > { %v1010_v50 = vpop.f32.mrf.mxu1  ;;  %p2048_p1 = scmp.ne.s32.totalorder %s2046_s0, %s2047_s19  ;;  %p2053_p8 = scmp.lt.s32.totalorder %s2051_s29, %s2047_s19 }
 0x3fb   : > { %p2049_p4 = pnand %p2048_p1, %p2363_p5  ;;  %p2054_p9 = por %p2053_p8, %p2052_p7 }
 0x3fd   : > { %p2050_p12 = pneg %p2049_p4 }
 0x3ff   : > { %p2055_p10 = pnand %p2054_p9, %p2050_p12 }
 0x452   : > { %v1080_v51 = vpop.permute.xlu2 %1079 }
 0x453   : > { %v1082_v52 = vsel %vm949_vm2, %v1010_v50, %v1080_v51 }
 0x454   : > { %1513 = vmatmul.msk.f32.vlgmr.msrb.gmra.mxu0 %vm891_vm0, %v1082_v52  ;;  %v1684_v52 = vld [vmem:[#allocation17] ss:$0 sm:$0xff] }
 0x4d1   : > { %v1109_v54 = vpop.f32.mrf.mxu0 }
 0x4d2   : > { %v1110_v55 = vadd.f32 %v1679_v53, %v1109_v54 }
 0x4d4   : > { %v1112_v56 = vadd.f32 %v1110_v55, %v884_v14  ;;  %v1685_v55 = vld [vmem:[#allocation19] ss:$0 sm:$0xff] }
 0x4d6   : > { %v1113_v57 = vsel %vm891_vm0, %v1112_v56, 0.0 }
 0x4d7   : > { %1114 = vadd.xlane.f32.xlu2 %v1113_v57 }
 0x54a   : > { %v1115_v1 = vpop.xlane.xlu2 %1114 }
 0x54b   : > { %v1123_v2 = vmul.f32 %v1122_v0, %v1115_v1 }
 0x54d   : > { %v1124_v3 = vsub.f32 %v1112_v56, %v1123_v2 }
 0x54f   : > { %v1125_v4 = vmul.f32 %v1124_v3, %v1124_v3 }
 0x551   : > { %v1126_v5 = vsel %vm891_vm0, %v1125_v4, 0.0 }
 0x552   : > { %1127 = vadd.xlane.f32.xlu1 %v1126_v5 }
 0x5c5   : > { %v1128_v9 = vpop.xlane.xlu1 %1127 }
 0x5c6   : > { %v1129_v10 = vmul.f32 %v1128_v9, %v1122_v0 }
 0x5c8   : > { %v1130_v11 = vadd.f32 1e-05, %v1129_v10 }
 0x5ca   : > { %1697 = vrsqrt.f32 %v1130_v11  ;;  %vm1137_vm5 = vweird.f32 %v1130_v11 }
 0x5d0   : > { %v1698_v12 = vpop.eup %1697 }
 0x5d1   : > { %v1132_v13 = vmul.f32 %v1698_v12, %v1130_v11  ;;  %vm1138_vm4 = vweird.f32 %v1698_v12 }
 0x5d2   : > { %vm1139_vm6 = vmor %vm1137_vm5, %vm1138_vm4 }
 0x5d3   : > { %v1133_v14 = vmul.f32 %v1698_v12, %v1132_v13 }
 0x5d5   : > { %v1134_v15 = vmul.f32 0.5, %v1133_v14 }
 0x5d7   : > { %v1135_v16 = vsub.f32 1.5, %v1134_v15 }
 0x5d9   : > { %v1136_v17 = vmul.f32 %v1698_v12, %v1135_v16 }
 0x5db   : > { %v1140_v19 = vsel %vm1139_vm6, %v1698_v12, %v1136_v17 }
 0x5dc   : > { %v1141_v20 = vmul.f32 %v1140_v19, %v1124_v3 }
 0x5de   : > { %v1146_v22 = vmul.f32 %v1680_v18, %v1141_v20 }
 0x5e0   : > { %v1151_v23 = vadd.f32 %v1681_v21, %v1146_v22 }
 0x5e2   : > { %1514 = vmatmul.msk.f32.vlgmr.msra.gmra.mxu1 %vm891_vm0, %v1151_v23 }
 0x65f   : > { %v1178_v28 = vpop.f32.mrf.mxu1 }
 0x660   : > { %v1179_v29 = vadd.f32 %v1682_v27, %v1178_v28 }
 0x662   : > { %v1181_v30 = vmax.f32 %v1179_v29, 0.0 }
 0x664   : > { %1515 = vmatmul.msk.f32.vlgmr.msra.gmra.mxu2 %vm860_vm1, %v1181_v30 }
 0x6e7   : > { %v1210_v32 = vpop.f32.mrf.mxu2 }
 0x6e8   : > { %v1211_v33 = vadd.f32 %v1683_v31, %v1210_v32 }
 0x6ea   : > { %v1213_v34 = vadd.f32 %v1211_v33, %v1151_v23 }
 0x6ec   : > { %v1214_v35 = vsel %vm891_vm0, %v1213_v34, 0.0 }
 0x6ed   : > { %1215 = vadd.xlane.f32.xlu0 %v1214_v35 }
 0x760   : > { %v1216_v36 = vpop.xlane.xlu0 %1215 }
 0x761   : > { %v1217_v37 = vmul.f32 %v1216_v36, %v1122_v0 }
 0x763   : > { %v1218_v38 = vsub.f32 %v1213_v34, %v1217_v37 }
 0x765   : > { %v1219_v39 = vmul.f32 %v1218_v38, %v1218_v38 }
 0x767   : > { %v1220_v40 = vsel %vm891_vm0, %v1219_v39, 0.0 }
 0x768   : > { %1221 = vadd.xlane.f32.xlu0 %v1220_v40 }
 0x7db   : > { %v1222_v43 = vpop.xlane.xlu0 %1221 }
 0x7dc   : > { %v1223_v44 = vmul.f32 %v1222_v43, %v1122_v0 }
 0x7de   : > { %v1224_v45 = vadd.f32 1e-05, %v1223_v44 }
 0x7e0   : > { %1699 = vrsqrt.f32 %v1224_v45  ;;  %vm1231_vm8 = vweird.f32 %v1224_v45 }
 0x7e6   : > { %v1700_v46 = vpop.eup %1699 }
 0x7e7   : > { %v1226_v47 = vmul.f32 %v1700_v46, %v1224_v45  ;;  %vm1232_vm7 = vweird.f32 %v1700_v46 }
 0x7e8   : > { %vm1233_vm9 = vmor %vm1231_vm8, %vm1232_vm7 }
 0x7e9   : > { %v1227_v48 = vmul.f32 %v1700_v46, %v1226_v47 }
 0x7eb   : > { %v1228_v49 = vmul.f32 0.5, %v1227_v48 }
 0x7ed   : > { %v1229_v50 = vsub.f32 1.5, %v1228_v49 }
 0x7ef   : > { %v1230_v51 = vmul.f32 %v1700_v46, %v1229_v50 }
 0x7f1   : > { %v1234_v53 = vsel %vm1233_vm9, %v1700_v46, %v1230_v51 }
 0x7f2   : > { %v1235_v54 = vmul.f32 %v1234_v53, %v1218_v38 }
 0x7f4   : > { %v1240_v56 = vmul.f32 %v1684_v52, %v1235_v54 }
 0x7f6   : > { %v1245_v57 = vadd.f32 %v1685_v55, %v1240_v56 }
 0x7f8   : > { %1516 = vmatmul.msk.f32.vlgmr.msra.gmra.mxu3 %vm891_vm0, %v1245_v57 }
 0x87b   : > { %v1272_v59 = vpop.f32.mrf.mxu3 }
 0x87c   : > { %v1273_v60 = vadd.f32 %v1686_v58, %v1272_v59 }
 0x87e   : > { %1275 = vst.msk [vmem:[%s842_s10] sm:$0xff] %vm860_vm1, %v1273_v60 }
 0x87f   : > { %2058 = shalt.err (!%p2055_p10)
}
 0x880   : > { %1563 = dma.vmem_to_hbm [thread:$0]  (%p2363_p5), %s1290_s8, 128, %s1292_s13, %s1277_s24  }
 0x881 PF: > { %s1303_s12 = sand.u32 1, %s2105_s2   ;;  %p2622_p13 = scmp.ge.s32.totalorder %s2117_s27, 2 }
 0x882   : > { %s1304_s14 = scalar_lea.sflag [#allocation4], %s1303_s12 }
 0x883   : > { %p1601_p11 = pnand %p2622_p13, %p2367_p6 }
 0x885   : > { %p1602_p0 = pneg %p1601_p11 }
 0x887   : > { %2100 = dma.done.wait (%p1602_p0), %s1304_s14, 128  }
 0x888   : > { %2102 = vsyncadd (%p1602_p0), %s1304_s14, 4294967168  ;;  %p39_p2 = scmp.ge.s32.totalorder %s2337_s21, 4   ;;  %s2623_s2 = smov %s2109_s25 }
 0x889   : > { %s2624_s25 = smov %s2113_s26  ;;  %s2625_s26 = smov %s2348_s28 }
 0x88a   : > { %s2626_s27 = smov %s2337_s21  ;;  %41 = sbr.rel (!%p39_p2) target bundleno = 29 (0x1d), region = 195 }
 0x88f   :  { %1310 = vsyncpa [#allocation3], 1 }
 0x890   :  { %1312 = vsyncpa [#allocation3 + $0x1], 1 }
 0x891   :  { %1313 = vsyncpa [#allocation6], 1 }
 0x892   :  { %1314 = vsyncpa [#allocation9], 1 }
 0x893   :  { %1315 = vsyncpa [#allocation12], 1 }
 0x894   :  { %1316 = vsyncpa [#allocation15], 1 }
 0x895   :  { %1317 = vsyncpa [#allocation18], 1 }
 0x896   :  { %1318 = vsyncpa [#allocation4], 1 }
 0x897   :  { %1320 = vsyncpa [#allocation4 + $0x1], 1 }

</bundles_post_ra>
